<compile_context>
chip_gen: v7x
topology: tpu7x:2x2x1
jax: 0.10.0
libtpu: 0.0.40
codegen_flags: <defaults>
</compile_context>

<pallas_src>
import functools

import jax
import jax.numpy as jnp
from jax.experimental import pallas as pl
from jax.experimental.pallas import tpu as pltpu

LANE = 128      # vreg lane width: last dims padded to a multiple of this
SUBLANE = 8     # sublane granularity for batch tiles

# Probe: can BlockSpec request single-buffering for constant-index (resident) operands?
try:
    pl.BlockSpec((SUBLANE, LANE), lambda i: (0, 0), pipeline_mode=pl.Buffered(1))
    _HAS_PIPELINE_MODE = True
except Exception:  # very old Pallas: fall back to default double-buffering
    _HAS_PIPELINE_MODE = False


def mlp_kernel(x_ref, w1_ref, b1_ref, w2_ref, b2_ref, o_ref):
    """Fused 2-layer MLP tile: relu(x @ W1 + b1) @ W2 + b2.

    x_ref : (TB, D)        VMEM tile of the input batch
    w1_ref: (D, Hpad)      full first-layer weight (resident, single-buffered)
    b1_ref: (1, Hpad)      first-layer bias (f32, padded)
    w2_ref: (Hpad, Cpad)   full second-layer weight (resident, padded both dims)
    b2_ref: (1, Cpad)      second-layer bias (f32, padded)
    o_ref : (TB, Cpad)     lane-dense output tile (logits, padded)
    """
    x = x_ref[...]
    # First matmul on the MXU with f32 accumulation; bias add + ReLU in f32 on the VPU
    # (v5e has no bf16 VPU, so elementwise math stays f32 on every chip generation).
    h = jnp.dot(x, w1_ref[...], preferred_element_type=jnp.float32) + b1_ref[...]
    h = jnp.maximum(h, 0.0)
    # Feed the second MXU pass in the weights' dtype (bf16 on the fast path).
    h = h.astype(w2_ref.dtype)
    out = jnp.dot(h, w2_ref[...], preferred_element_type=jnp.float32) + b2_ref[...]
    o_ref[...] = out.astype(o_ref.dtype)


def _round_up(x, m):
    return (x + m - 1) // m * m


def _pick_tile_b(B):
    """MXU-friendly batch tile that keeps >= 2 grid steps.

    >= 2 steps lets the "parallel" batch axis shard across v7x's two TensorCores;
    the extra grid step is ~free on 1-TC v5e/v6e (~0.35 us). The 256 cap keeps the
    x tile bounded for very large D, while staying big enough to feed the MXU's M dim.
    """
    if B <= SUBLANE:
        return SUBLANE
    half = _round_up(pl.cdiv(B, 2), SUBLANE)
    return min(256, half)


def _vmem_cap_bytes():
    """~85% of physical VMEM (128 MiB on v5e/v6e, 64 MiB per TC on v7x)."""
    try:
        cap = pltpu.get_tpu_info().vmem_capacity_bytes
    except Exception:
        cap = 64 << 20  # conservative fallback
    return int(cap * 0.85)


@functools.partial(
    jax.jit, static_argnames=("tile_b", "compute_dtype", "single_buffer_weights")
)
def neural_net_forward(x, w1, b1, w2, b2, *, tile_b=None, compute_dtype=None,
                       single_buffer_weights=True):
    """relu(x @ W1 + b1) @ W2 + b2 as a single fused Pallas kernel.

    `compute_dtype=jnp.bfloat16` enables the bf16 MXU path on ALL generations
    (v5e's MXU is bf16-native at full rate too); accumulation, bias add and
    ReLU stay f32, so the fast path is valid on v5e despite its f32-only VPU.
    """
    B, D = x.shape
    H = w1.shape[1]
    C = w2.shape[1]
    out_dtype = x.dtype

    # ---- lane-dense padding of H and C (multiples of 128) -----------------------
    # Padded W1 columns / b1 entries are zero -> relu gives 0 there; padded W2 rows
    # are zero -> padded hidden units contribute nothing; padded W2 columns / b2 are
    # zero -> padded logits are zero and sliced off below. Numerics are unchanged.
    # TODO(synk): on v6e/v7x prefer 256-multiples for D/H to match the 256-wide MXU.
    H_pad = _round_up(max(H, LANE), LANE)
    C_pad = _round_up(max(C, LANE), LANE)
    if H_pad != H:
        w1 = jnp.pad(w1, ((0, 0), (0, H_pad - H)))
        b1 = jnp.pad(b1, ((0, 0), (0, H_pad - H)))
        w2 = jnp.pad(w2, ((0, H_pad - H), (0, 0)))
    if C_pad != C:
        w2 = jnp.pad(w2, ((0, 0), (0, C_pad - C)))
        b2 = jnp.pad(b2, ((0, 0), (0, C_pad - C)))

    # ---- batch pad-and-slice (no divisor hunting; awkward B stays MXU-friendly) --
    if tile_b is None:
        tile_b = _pick_tile_b(B)
    assert tile_b % SUBLANE == 0, "tile_b must be a multiple of 8"
    B_pad = _round_up(B, tile_b)
    if B_pad != B:
        x = jnp.pad(x, ((0, B_pad - B), (0, 0)))

    # Optional bf16 MXU path: bf16 inputs/weights, f32 accumulation (all chips).
    # TODO(synk): add an fp8 weight path (per-tensor scale applied after the f32
    # accumulation) for v7x inference to halve weight VMEM/HBM traffic again.
    if compute_dtype is not None:
        x = x.astype(compute_dtype)
        w1 = w1.astype(compute_dtype)
        w2 = w2.astype(compute_dtype)
    b1 = b1.astype(jnp.float32)
    b2 = b2.astype(jnp.float32)

    grid = (B_pad // tile_b,)
    use_single_buffer = single_buffer_weights and _HAS_PIPELINE_MODE
    wbuf = 1 if use_single_buffer else 2

    # Rough VMEM budget: double-buffered x/out tiles + resident weights + activation.
    vmem_bytes = (
        2 * tile_b * D * x.dtype.itemsize
        + 2 * tile_b * C_pad * jnp.dtype(out_dtype).itemsize
        + wbuf * (D * H_pad * w1.dtype.itemsize + H_pad * C_pad * w2.dtype.itemsize)
        + wbuf * (H_pad + C_pad) * 4
        + tile_b * H_pad * 4
    )
    compiler_kwargs = dict(dimension_semantics=("parallel",))
    if vmem_bytes > (8 << 20):
        # Raise the scoped limit only when weights are actually big; cap is
        # generation-aware (leaves headroom for internal/pipeline scratch).
        # TODO(synk): when single-buffered weights exceed ~half of per-TC VMEM
        # (much earlier on v7x's 64 MiB), add a reduction grid axis over D / split H
        # with an f32 VMEM accumulator (pl.when init on k==0, finalize on last k,
        # axis marked "arbitrary") instead of keeping both full weights resident.
        compiler_kwargs["vmem_limit_bytes"] = min(
            int(vmem_bytes * 3 // 2) + (4 << 20), _vmem_cap_bytes()
        )

    def resident(shape):
        # Constant index_map -> double-buffering buys nothing; single-buffer to
        # halve the resident-weight VMEM footprint.
        if use_single_buffer:
            return pl.BlockSpec(shape, lambda i: (0, 0), pipeline_mode=pl.Buffered(1))
        return pl.BlockSpec(shape, lambda i: (0, 0))

    cost = pl.CostEstimate(
        flops=2 * B_pad * (D * H_pad + H_pad * C_pad),
        transcendentals=0,
        bytes_accessed=(
            B_pad * D * x.dtype.itemsize
            + D * H_pad * w1.dtype.itemsize
            + H_pad * C_pad * w2.dtype.itemsize
            + (H_pad + C_pad) * 4
            + B_pad * C_pad * jnp.dtype(out_dtype).itemsize
        ),
    )

    out_padded = pl.pallas_call(
        mlp_kernel,
        out_shape=jax.ShapeDtypeStruct((B_pad, C_pad), out_dtype),
        grid_spec=pltpu.PrefetchScalarGridSpec(
            num_scalar_prefetch=0,
            grid=grid,
            in_specs=[
                pl.BlockSpec((tile_b, D), lambda i: (i, 0)),   # batch tile marches
                resident((D, H_pad)),                          # resident weights/biases
                resident((1, H_pad)),
                resident((H_pad, C_pad)),
                resident((1, C_pad)),
            ],
            out_specs=pl.BlockSpec((tile_b, C_pad), lambda i: (i, 0)),
        ),
        compiler_params=pltpu.CompilerParams(**compiler_kwargs),
        cost_estimate=cost,
    )(x, w1, b1, w2, b2)

    return out_padded[:B, :C]


def init_params(key, input_dim, layer_sizes, num_classes):
    """Deterministic PyTorch-style init: U(-1/sqrt(fan_in), 1/sqrt(fan_in))."""
    dims = [input_dim] + list(layer_sizes) + [num_classes]
    params = []
    for fan_in, fan_out in zip(dims[:-1], dims[1:]):
        key, kw, kb = jax.random.split(key, 3)
        bound = 1.0 / jnp.sqrt(jnp.float32(fan_in))
        w = jax.random.uniform(kw, (fan_in, fan_out), jnp.float32, -bound, bound)
        b = jax.random.uniform(kb, (1, fan_out), jnp.float32, -bound, bound)
        params.append((w, b))
    return params


def reference_forward(x, params):
    """Pure-JAX reference of the PyTorch forward pass (dropout=False)."""
    h = x
    for i, (w, b) in enumerate(params):
        h = h @ w + b
        if i < len(params) - 1:
            h = jnp.maximum(h, 0.0)
    return h


if __name__ == "__main__":
    # Small shapes consistent with NeuralNet(input_dim=32, layer_sizes=[64], num_classes=2)
    B, D, H, C = 16, 32, 64, 2

    key = jax.random.PRNGKey(0)
    key, kx = jax.random.split(key)
    x = jax.random.normal(kx, (B, D), jnp.float32)

    params = init_params(key, input_dim=D, layer_sizes=[H], num_classes=C)
    (w1, b1), (w2, b2) = params

    ref = reference_forward(x, params)

    # f32 path — bit-accurate check against the reference. Fall back to default
    # (double-buffered) weight specs if this Pallas build rejects Buffered(1).
    try:
        out = jax.block_until_ready(neural_net_forward(x, w1, b1, w2, b2))
        sb = True
    except Exception:
        sb = False
        out = jax.block_until_ready(
            neural_net_forward(x, w1, b1, w2, b2, single_buffer_weights=False)
        )
    assert out.shape == (B, C)
    assert jnp.allclose(out, ref, atol=1e-5, rtol=1e-5), "f32 Pallas output mismatch"

    # bf16-input / f32-accumulate fast path (valid on v5e/v6e/v7x) — looser tolerance.
    out_bf16 = neural_net_forward(
        x, w1, b1, w2, b2, compute_dtype=jnp.bfloat16, single_buffer_weights=sb
    )
    out_bf16 = jax.block_until_ready(out_bf16)
    assert out_bf16.shape == (B, C)
    assert jnp.allclose(out_bf16, ref, atol=5e-2, rtol=5e-2), "bf16 Pallas output mismatch"

    print("KERNEL_OK")
</pallas_src>

<mosaic_0001>
module attributes {stable_mosaic.version = 11 : i64} {
  func.func @mlp_kernel(%arg0: i32, %arg1: memref<8x32xf32, #tpu.memory_space<vmem>>, %arg2: memref<32x128xf32, #tpu.memory_space<vmem>>, %arg3: memref<1x128xf32, #tpu.memory_space<vmem>>, %arg4: memref<128x128xf32, #tpu.memory_space<vmem>>, %arg5: memref<1x128xf32, #tpu.memory_space<vmem>>, %arg6: memref<8x128xf32, #tpu.memory_space<vmem>>) attributes {dimension_semantics = [#tpu.dimension_semantics<parallel>], iteration_bounds = array<i64: 2>, scalar_prefetch = 0 : i64, scratch_operands = 0 : i64, tpu.core_type = #tpu.core_type<tc>, window_params = [{transform_indices = @transform_0, window_bounds = array<i64: 8, 32>}, {pipeline_mode = #tpu.pipeline_mode<synchronous>, transform_indices = @transform_1, window_bounds = array<i64: 32, 128>}, {pipeline_mode = #tpu.pipeline_mode<synchronous>, transform_indices = @transform_2, window_bounds = array<i64: 1, 128>}, {pipeline_mode = #tpu.pipeline_mode<synchronous>, transform_indices = @transform_3, window_bounds = array<i64: 128, 128>}, {pipeline_mode = #tpu.pipeline_mode<synchronous>, transform_indices = @transform_4, window_bounds = array<i64: 1, 128>}, {transform_indices = @transform_5, window_bounds = array<i64: 8, 128>}]} {
    %c0 = arith.constant 0 : index
    %c0_0 = arith.constant 0 : index
    %0 = vector.load %arg1[%c0, %c0_0] : memref<8x32xf32, #tpu.memory_space<vmem>>, vector<8x32xf32>
    %c0_1 = arith.constant 0 : index
    %c0_2 = arith.constant 0 : index
    %1 = vector.load %arg2[%c0_1, %c0_2] : memref<32x128xf32, #tpu.memory_space<vmem>>, vector<32x128xf32>
    %cst = arith.constant dense<0.000000e+00> : vector<8x128xf32>
    %2 = tpu.matmul %0, %1, %cst {dimension_numbers = #tpu.dot_dimension_numbers<[1], [0], [0], [1], [0, 0, 1, 1], [], []>} : vector<8x32xf32>, vector<32x128xf32>, vector<8x128xf32> -> vector<8x128xf32>
    %c0_3 = arith.constant 0 : index
    %c0_4 = arith.constant 0 : index
    %3 = vector.load %arg3[%c0_3, %c0_4] : memref<1x128xf32, #tpu.memory_space<vmem>>, vector<1x128xf32>
    %4 = vector.broadcast %3 : vector<1x128xf32> to vector<8x128xf32>
    %5 = arith.addf %2, %4 : vector<8x128xf32>
    %cst_5 = arith.constant 0.000000e+00 : f32
    %6 = vector.broadcast %cst_5 : f32 to vector<8x128xf32>
    %7 = arith.maximumf %5, %6 : vector<8x128xf32>
    %c0_6 = arith.constant 0 : index
    %c0_7 = arith.constant 0 : index
    %8 = vector.load %arg4[%c0_6, %c0_7] : memref<128x128xf32, #tpu.memory_space<vmem>>, vector<128x128xf32>
    %cst_8 = arith.constant dense<0.000000e+00> : vector<8x128xf32>
    %9 = tpu.matmul %7, %8, %cst_8 {dimension_numbers = #tpu.dot_dimension_numbers<[1], [0], [0], [1], [0, 0, 1, 1], [], []>} : vector<8x128xf32>, vector<128x128xf32>, vector<8x128xf32> -> vector<8x128xf32>
    %c0_9 = arith.constant 0 : index
    %c0_10 = arith.constant 0 : index
    %10 = vector.load %arg5[%c0_9, %c0_10] : memref<1x128xf32, #tpu.memory_space<vmem>>, vector<1x128xf32>
    %11 = vector.broadcast %10 : vector<1x128xf32> to vector<8x128xf32>
    %12 = arith.addf %9, %11 : vector<8x128xf32>
    %c0_11 = arith.constant 0 : index
    %c0_12 = arith.constant 0 : index
    %13 = vector.load %arg6[%c0_11, %c0_12] : memref<8x128xf32, #tpu.memory_space<vmem>>, vector<8x128xf32>
    tpu.vector_store %arg6[%c0_11, %c0_12], %12 {strides = array<i32>} : memref<8x128xf32, #tpu.memory_space<vmem>>, vector<8x128xf32>,
    return
  }
  func.func @transform_0(%arg0: i32) -> (i32, i32) {
    %c0_i32 = arith.constant 0 : i32
    %c0_i32_0 = arith.constant 0 : i32
    return %arg0, %c0_i32 : i32, i32
  }
  func.func @transform_1(%arg0: i32) -> (i32, i32) {
    %c0_i32 = arith.constant 0 : i32
    %c0_i32_0 = arith.constant 0 : i32
    %c0_i32_1 = arith.constant 0 : i32
    return %c0_i32, %c0_i32_0 : i32, i32
  }
  func.func @transform_2(%arg0: i32) -> (i32, i32) {
    %c0_i32 = arith.constant 0 : i32
    %c0_i32_0 = arith.constant 0 : i32
    %c0_i32_1 = arith.constant 0 : i32
    return %c0_i32, %c0_i32_0 : i32, i32
  }
  func.func @transform_3(%arg0: i32) -> (i32, i32) {
    %c0_i32 = arith.constant 0 : i32
    %c0_i32_0 = arith.constant 0 : i32
    %c0_i32_1 = arith.constant 0 : i32
    return %c0_i32, %c0_i32_0 : i32, i32
  }
  func.func @transform_4(%arg0: i32) -> (i32, i32) {
    %c0_i32 = arith.constant 0 : i32
    %c0_i32_0 = arith.constant 0 : i32
    %c0_i32_1 = arith.constant 0 : i32
    return %c0_i32, %c0_i32_0 : i32, i32
  }
  func.func @transform_5(%arg0: i32) -> (i32, i32) {
    %c0_i32 = arith.constant 0 : i32
    %c0_i32_0 = arith.constant 0 : i32
    return %arg0, %c0_i32 : i32, i32
  }
}

module attributes {stable_mosaic.version = 11 : i64} {
  func.func @mlp_kernel(%arg0: i32, %arg1: memref<8x32xf32, #tpu.memory_space<vmem>>, %arg2: memref<32x128xf32, #tpu.memory_space<vmem>>, %arg3: memref<1x128xf32, #tpu.memory_space<vmem>>, %arg4: memref<128x128xf32, #tpu.memory_space<vmem>>, %arg5: memref<1x128xf32, #tpu.memory_space<vmem>>, %arg6: memref<8x128xf32, #tpu.memory_space<vmem>>) attributes {dimension_semantics = [#tpu.dimension_semantics<parallel>], iteration_bounds = array<i64: 2>, scalar_prefetch = 0 : i64, scratch_operands = 0 : i64, tpu.core_type = #tpu.core_type<tc>, window_params = [{transform_indices = @transform_0, window_bounds = array<i64: 8, 32>}, {pipeline_mode = #tpu.pipeline_mode<synchronous>, transform_indices = @transform_1, window_bounds = array<i64: 32, 128>}, {pipeline_mode = #tpu.pipeline_mode<synchronous>, transform_indices = @transform_2, window_bounds = array<i64: 1, 128>}, {pipeline_mode = #tpu.pipeline_mode<synchronous>, transform_indices = @transform_3, window_bounds = array<i64: 128, 128>}, {pipeline_mode = #tpu.pipeline_mode<synchronous>, transform_indices = @transform_4, window_bounds = array<i64: 1, 128>}, {transform_indices = @transform_5, window_bounds = array<i64: 8, 128>}]} {
    %c0 = arith.constant 0 : index
    %c0_0 = arith.constant 0 : index
    %0 = vector.load %arg1[%c0, %c0_0] : memref<8x32xf32, #tpu.memory_space<vmem>>, vector<8x32xf32>
    %c0_1 = arith.constant 0 : index
    %c0_2 = arith.constant 0 : index
    %1 = vector.load %arg2[%c0_1, %c0_2] : memref<32x128xf32, #tpu.memory_space<vmem>>, vector<32x128xf32>
    %cst = arith.constant dense<0.000000e+00> : vector<8x128xf32>
    %2 = tpu.matmul %0, %1, %cst {dimension_numbers = #tpu.dot_dimension_numbers<[1], [0], [0], [1], [0, 0, 1, 1], [], []>} : vector<8x32xf32>, vector<32x128xf32>, vector<8x128xf32> -> vector<8x128xf32>
    %c0_3 = arith.constant 0 : index
    %c0_4 = arith.constant 0 : index
    %3 = vector.load %arg3[%c0_3, %c0_4] : memref<1x128xf32, #tpu.memory_space<vmem>>, vector<1x128xf32>
    %4 = vector.broadcast %3 : vector<1x128xf32> to vector<8x128xf32>
    %5 = arith.addf %2, %4 : vector<8x128xf32>
    %cst_5 = arith.constant 0.000000e+00 : f32
    %6 = vector.broadcast %cst_5 : f32 to vector<8x128xf32>
    %7 = arith.maximumf %5, %6 : vector<8x128xf32>
    %c0_6 = arith.constant 0 : index
    %c0_7 = arith.constant 0 : index
    %8 = vector.load %arg4[%c0_6, %c0_7] : memref<128x128xf32, #tpu.memory_space<vmem>>, vector<128x128xf32>
    %cst_8 = arith.constant dense<0.000000e+00> : vector<8x128xf32>
    %9 = tpu.matmul %7, %8, %cst_8 {dimension_numbers = #tpu.dot_dimension_numbers<[1], [0], [0], [1], [0, 0, 1, 1], [], []>} : vector<8x128xf32>, vector<128x128xf32>, vector<8x128xf32> -> vector<8x128xf32>
    %c0_9 = arith.constant 0 : index
    %c0_10 = arith.constant 0 : index
    %10 = vector.load %arg5[%c0_9, %c0_10] : memref<1x128xf32, #tpu.memory_space<vmem>>, vector<1x128xf32>
    %11 = vector.broadcast %10 : vector<1x128xf32> to vector<8x128xf32>
    %12 = arith.addf %9, %11 : vector<8x128xf32>
    %c0_11 = arith.constant 0 : index
    %c0_12 = arith.constant 0 : index
    %13 = vector.load %arg6[%c0_11, %c0_12] : memref<8x128xf32, #tpu.memory_space<vmem>>, vector<8x128xf32>
    tpu.vector_store %arg6[%c0_11, %c0_12], %12 {strides = array<i32>} : memref<8x128xf32, #tpu.memory_space<vmem>>, vector<8x128xf32>,
    return
  }
  func.func @transform_0(%arg0: i32) -> (i32, i32) {
    %c0_i32 = arith.constant 0 : i32
    %c0_i32_0 = arith.constant 0 : i32
    return %arg0, %c0_i32 : i32, i32
  }
  func.func @transform_1(%arg0: i32) -> (i32, i32) {
    %c0_i32 = arith.constant 0 : i32
    %c0_i32_0 = arith.constant 0 : i32
    %c0_i32_1 = arith.constant 0 : i32
    return %c0_i32, %c0_i32_0 : i32, i32
  }
  func.func @transform_2(%arg0: i32) -> (i32, i32) {
    %c0_i32 = arith.constant 0 : i32
    %c0_i32_0 = arith.constant 0 : i32
    %c0_i32_1 = arith.constant 0 : i32
    return %c0_i32, %c0_i32_0 : i32, i32
  }
  func.func @transform_3(%arg0: i32) -> (i32, i32) {
    %c0_i32 = arith.constant 0 : i32
    %c0_i32_0 = arith.constant 0 : i32
    %c0_i32_1 = arith.constant 0 : i32
    return %c0_i32, %c0_i32_0 : i32, i32
  }
  func.func @transform_4(%arg0: i32) -> (i32, i32) {
    %c0_i32 = arith.constant 0 : i32
    %c0_i32_0 = arith.constant 0 : i32
    %c0_i32_1 = arith.constant 0 : i32
    return %c0_i32, %c0_i32_0 : i32, i32
  }
  func.func @transform_5(%arg0: i32) -> (i32, i32) {
    %c0_i32 = arith.constant 0 : i32
    %c0_i32_0 = arith.constant 0 : i32
    return %arg0, %c0_i32 : i32, i32
  }
}

</mosaic_0001>

<bundles_post_ra>
// kernel: neural_net_forward.1
= control target key start
LH: loop header
LB: loop body
LE: loop exit
PB: predicated region body
PF: predicated region fallthrough
CT: control target
= control target key end

     0   :  { %s616_s18 = smov 0   ;;  %s706_s0 = inlined_call_operand.vmem [shape: f32[16,32], index: 0, kind: input, shape index: {}]   ;;  %s707_s1 = inlined_call_operand.vmem [shape: f32[32,128], index: 1, kind: input, shape index: {}]   ;;  %s708_s2 = inlined_call_operand.vmem [shape: f32[1,128], index: 2, kind: input, shape index: {}]   ;;  %s709_s3 = inlined_call_operand.vmem [shape: f32[128,128], index: 3, kind: input, shape index: {}]   ;;  %s710_s4 = inlined_call_operand.vmem [shape: f32[1,128], index: 4, kind: input, shape index: {}]   ;;  %s711_s5 = inlined_call_operand.vmem [shape: f32[16,128], index: 5, kind: output, shape index: {}]  }
   0x1 LB: > { %s454_s19 = sadd.s32 4294967295, %s581_s18   ;;  %p458_p0 = scmp.ge.s32.totalorder %s581_s18, 1  ;;  %s581_s18 = sphi %s616_s18, %s15_s18  }
   0x2   : > { %p186_p1 = scmp.lt.s32.totalorder %s581_s18, 3 }
   0x4   : > { %p187_p2 = pnand %p458_p0, %p186_p1 }
   0x5   : > { %v221_v0 = vld [vmem:[%s707_s1] sm:$0xff] (!%p187_p2)  ;;  %v222_v1 = vld [vmem:[%s707_s1 + $0x8] sm:$0xff] (!%p187_p2)  ;;  %v223_v2 = vld [vmem:[%s707_s1 + $0x10] sm:$0xff] (!%p187_p2)  ;;  %v583_v3 = vmov (!%p187_p2), 0.0|0.0   ;;  %vm584_vm0 = vmmov (!%p187_p2), 0   ;;  %v585_v6 = vmov (!%p187_p2), 0.0  }
   0x6   : > { %190 = sbr.rel (%p187_p2) target bundleno = 448 (0x1c0), region = 40  ;;  %534 = vmatprep.subr.bf16.mxu0 (!%p187_p2), %v583_v3  ;;  %v535_v4 = vpack.c.bf16 (!%p187_p2), %v222_v1, %v221_v0  ;;  %v224_v5 = vld [vmem:[%s707_s1 + $0x18] sm:$0xff] (!%p187_p2)  ;;  %496 = vmatprep.mubr.msk.f32.mxu0 (!%p187_p2), %vm584_vm0, %v585_v6  ;;  %p212_p3 = scmp.lt.s32.totalorder (!%p187_p2), %s454_s19, 1  ;;  %v307_v7 = vld [vmem:[%s709_s3] sm:$0xff] (!%p187_p2)  ;;  %v308_v8 = vld [vmem:[%s709_s3 + $0x8] sm:$0xff] (!%p187_p2)  ;;  %vm232_vm1 = vcmask (!%p187_p2), 261120  }
   0x7   : > { %540 = vmatprep.subr.bf16.mxu1 (!%p187_p2), %v583_v3  ;;  %v541_v9 = vpack.c.bf16 (!%p187_p2), %v308_v8, %v307_v7  ;;  %v309_v10 = vld [vmem:[%s709_s3 + $0x10] sm:$0xff] (!%p187_p2)  ;;  %v310_v11 = vld [vmem:[%s709_s3 + $0x18] sm:$0xff] (!%p187_p2)  ;;  %531 = vmatprep.mubr.msk.f32.mxu1 (!%p187_p2), %vm584_vm0, %v585_v6  ;;  %v538_v12 = vpack.c.bf16 (!%p187_p2), %v224_v5, %v223_v2  ;;  %v311_v14 = vld [vmem:[%s709_s3 + $0x20] sm:$0xff] (!%p187_p2) }
   0x8   : > { %536 = vmatpush3.bf16.msra.mxu0 (!%p187_p2), %v535_v4  ;;  %v544_v13 = vpack.c.bf16 (!%p187_p2), %v310_v11, %v309_v10  ;;  %v312_v15 = vld [vmem:[%s709_s3 + $0x28] sm:$0xff] (!%p187_p2)  ;;  %v313_v18 = vld [vmem:[%s709_s3 + $0x30] sm:$0xff] (!%p187_p2)  ;;  %v314_v19 = vld [vmem:[%s709_s3 + $0x38] sm:$0xff] (!%p187_p2) }
   0x9   : > { %537 = vmatprep.subr.bf16.mxu0 (!%p187_p2), %v583_v3  ;;  %542 = vmatpush3.bf16.msra.mxu1 (!%p187_p2), %v541_v9  ;;  %v547_v17 = vpack.c.bf16 (!%p187_p2), %v312_v15, %v311_v14  ;;  %v550_v20 = vpack.c.bf16 (!%p187_p2), %v314_v19, %v313_v18  ;;  %v315_v21 = vld [vmem:[%s709_s3 + $0x40] sm:$0xff] (!%p187_p2)  ;;  %v316_v22 = vld [vmem:[%s709_s3 + $0x48] sm:$0xff] (!%p187_p2)  ;;  %v317_v24 = vld [vmem:[%s709_s3 + $0x50] sm:$0xff] (!%p187_p2) }
   0xa   : > { %543 = vmatprep.subr.bf16.mxu1 (!%p187_p2), %v583_v3  ;;  %v553_v23 = vpack.c.bf16 (!%p187_p2), %v316_v22, %v315_v21  ;;  %v318_v25 = vld [vmem:[%s709_s3 + $0x58] sm:$0xff] (!%p187_p2)  ;;  %v319_v27 = vld [vmem:[%s709_s3 + $0x60] sm:$0xff] (!%p187_p2)  ;;  %v320_v28 = vld [vmem:[%s709_s3 + $0x68] sm:$0xff] (!%p187_p2) }
   0xb   : > { %v556_v26 = vpack.c.bf16 (!%p187_p2), %v318_v25, %v317_v24  ;;  %v559_v29 = vpack.c.bf16 (!%p187_p2), %v320_v28, %v319_v27  ;;  %v321_v30 = vld [vmem:[%s709_s3 + $0x70] sm:$0xff] (!%p187_p2)  ;;  %v322_v31 = vld [vmem:[%s709_s3 + $0x78] sm:$0xff] (!%p187_p2)  ;;  %v461_v33 = vld [vmem:[%s708_s2] ss:$0 sm:$0xff] (!%p187_p2) }
   0xc   : > { %539 = vmatpush3.bf16.msra.mxu0 (!%p187_p2), %v538_v12  ;;  %v562_v32 = vpack.c.bf16 (!%p187_p2), %v322_v31, %v321_v30  ;;  %v463_v38 = vld [vmem:[%s710_s4] ss:$0 sm:$0xff] (!%p187_p2) }
   0xd   : > { %s713_s19 = smov (!%p212_p3, %s454_s19), 1  ;;  %545 = vmatpush3.bf16.msra.mxu1 %v544_v13 }
   0xe   : > { %s459_s11 = sshll.u32 %s713_s19, 3  ;;  %546 = vmatprep.subr.bf16.mxu1 %v583_v3 }
   0xf   : > { %s215_s20 = scalar_lea.vmem %s706_s0, %s459_s11  ;;  %s219_s25 = scalar_lea.vmem %s711_s5, %s459_s11 }
  0x10   : > { %v220_v16 = vld [vmem:[%s215_s20] sm:$0xff] }
  0x11   : > { %497 = vmatmul.mubr.msk.f32.vlgmr.msra.gmra.mrb[0].mxu0 %vm232_vm1, %v220_v16  ;;  %548 = vmatpush3.bf16.msra.mxu1 %v547_v17 }
  0x12   : > { %549 = vmatprep.subr.bf16.mxu1 %v583_v3 }
  0x15   : > { %551 = vmatpush3.bf16.msra.mxu1 %v550_v20 }
  0x16   : > { %552 = vmatprep.subr.bf16.mxu1 %v583_v3 }
  0x19   : > { %554 = vmatpush3.bf16.msra.mxu1 %v553_v23 }
  0x1a   : > { %555 = vmatprep.subr.bf16.mxu1 %v583_v3 }
  0x1d   : > { %557 = vmatpush3.bf16.msra.mxu1 %v556_v26 }
  0x1e   : > { %558 = vmatprep.subr.bf16.mxu1 %v583_v3 }
  0x21   : > { %560 = vmatpush3.bf16.msra.mxu1 %v559_v29 }
  0x22   : > { %561 = vmatprep.subr.bf16.mxu1 %v583_v3 }
  0x25   : > { %563 = vmatpush3.bf16.msra.mxu1 %v562_v32 }
  0xe4   : > { %v302_v34 = vpop.f32.mrb[0].mxu0 }
  0xe5   : > { %v303_v35 = vadd.f32 %v461_v33, %v302_v34  ;;  %v498_v36 = vpop.f32.mrb[1].mxu0 }
  0xe7   : > { %v306_v37 = vmax.f32 %v303_v35, 0.0 }
  0xe9   : > { %532 = vmatmul.mubr.f32.vlgmr.msra.gmra.mrb[0].mxu1 %v306_v37 }
 0x1bc   : > { %v396_v39 = vpop.f32.mrb[0].mxu1 }
 0x1bd   : > { %v397_v40 = vadd.f32 %v463_v38, %v396_v39  ;;  %v533_v41 = vpop.f32.mrb[1].mxu1 }
 0x1bf   : > { %400 = vst [vmem:[%s219_s25] sm:$0xff] %v397_v40 }
 0x1c0 PF: > { %s15_s18 = sadd.s32 1, %s581_s18  }
 0x1c1   : > { %p12_p4 = scmp.ge.s32.totalorder %s15_s18, 4  }
 0x1c3   :  { %14 = sbr.rel (!%p12_p4) target bundleno = 1 (0x1), region = 70 }

// kernel: neural_net_forward.1
= control target key start
LH: loop header
LB: loop body
LE: loop exit
PB: predicated region body
PF: predicated region fallthrough
CT: control target
= control target key end

     0   :  { %s616_s18 = smov 0   ;;  %s706_s0 = inlined_call_operand.vmem [shape: f32[16,32], index: 0, kind: input, shape index: {}]   ;;  %s707_s1 = inlined_call_operand.vmem [shape: f32[32,128], index: 1, kind: input, shape index: {}]   ;;  %s708_s2 = inlined_call_operand.vmem [shape: f32[1,128], index: 2, kind: input, shape index: {}]   ;;  %s709_s3 = inlined_call_operand.vmem [shape: f32[128,128], index: 3, kind: input, shape index: {}]   ;;  %s710_s4 = inlined_call_operand.vmem [shape: f32[1,128], index: 4, kind: input, shape index: {}]   ;;  %s711_s5 = inlined_call_operand.vmem [shape: f32[16,128], index: 5, kind: output, shape index: {}]  }
   0x1 LB: > { %s454_s19 = sadd.s32 4294967295, %s581_s18   ;;  %p458_p0 = scmp.ge.s32.totalorder %s581_s18, 1  ;;  %s581_s18 = sphi %s616_s18, %s15_s18  }
   0x2   : > { %p186_p1 = scmp.lt.s32.totalorder %s581_s18, 3 }
   0x4   : > { %p187_p2 = pnand %p458_p0, %p186_p1 }
   0x5   : > { %v221_v0 = vld [vmem:[%s707_s1] sm:$0xff] (!%p187_p2)  ;;  %v222_v1 = vld [vmem:[%s707_s1 + $0x8] sm:$0xff] (!%p187_p2)  ;;  %v223_v2 = vld [vmem:[%s707_s1 + $0x10] sm:$0xff] (!%p187_p2)  ;;  %v583_v3 = vmov (!%p187_p2), 0.0|0.0   ;;  %vm584_vm0 = vmmov (!%p187_p2), 0   ;;  %v585_v6 = vmov (!%p187_p2), 0.0  }
   0x6   : > { %190 = sbr.rel (%p187_p2) target bundleno = 448 (0x1c0), region = 40  ;;  %534 = vmatprep.subr.bf16.mxu0 (!%p187_p2), %v583_v3  ;;  %v535_v4 = vpack.c.bf16 (!%p187_p2), %v222_v1, %v221_v0  ;;  %v224_v5 = vld [vmem:[%s707_s1 + $0x18] sm:$0xff] (!%p187_p2)  ;;  %496 = vmatprep.mubr.msk.f32.mxu0 (!%p187_p2), %vm584_vm0, %v585_v6  ;;  %p212_p3 = scmp.lt.s32.totalorder (!%p187_p2), %s454_s19, 1  ;;  %v307_v7 = vld [vmem:[%s709_s3] sm:$0xff] (!%p187_p2)  ;;  %v308_v8 = vld [vmem:[%s709_s3 + $0x8] sm:$0xff] (!%p187_p2)  ;;  %vm232_vm1 = vcmask (!%p187_p2), 261120  }
   0x7   : > { %540 = vmatprep.subr.bf16.mxu1 (!%p187_p2), %v583_v3  ;;  %v541_v9 = vpack.c.bf16 (!%p187_p2), %v308_v8, %v307_v7  ;;  %v309_v10 = vld [vmem:[%s709_s3 + $0x10] sm:$0xff] (!%p187_p2)  ;;  %v310_v11 = vld [vmem:[%s709_s3 + $0x18] sm:$0xff] (!%p187_p2)  ;;  %531 = vmatprep.mubr.msk.f32.mxu1 (!%p187_p2), %vm584_vm0, %v585_v6  ;;  %v538_v12 = vpack.c.bf16 (!%p187_p2), %v224_v5, %v223_v2  ;;  %v311_v14 = vld [vmem:[%s709_s3 + $0x20] sm:$0xff] (!%p187_p2) }
   0x8   : > { %536 = vmatpush3.bf16.msra.mxu0 (!%p187_p2), %v535_v4  ;;  %v544_v13 = vpack.c.bf16 (!%p187_p2), %v310_v11, %v309_v10  ;;  %v312_v15 = vld [vmem:[%s709_s3 + $0x28] sm:$0xff] (!%p187_p2)  ;;  %v313_v18 = vld [vmem:[%s709_s3 + $0x30] sm:$0xff] (!%p187_p2)  ;;  %v314_v19 = vld [vmem:[%s709_s3 + $0x38] sm:$0xff] (!%p187_p2) }
   0x9   : > { %537 = vmatprep.subr.bf16.mxu0 (!%p187_p2), %v583_v3  ;;  %542 = vmatpush3.bf16.msra.mxu1 (!%p187_p2), %v541_v9  ;;  %v547_v17 = vpack.c.bf16 (!%p187_p2), %v312_v15, %v311_v14  ;;  %v550_v20 = vpack.c.bf16 (!%p187_p2), %v314_v19, %v313_v18  ;;  %v315_v21 = vld [vmem:[%s709_s3 + $0x40] sm:$0xff] (!%p187_p2)  ;;  %v316_v22 = vld [vmem:[%s709_s3 + $0x48] sm:$0xff] (!%p187_p2)  ;;  %v317_v24 = vld [vmem:[%s709_s3 + $0x50] sm:$0xff] (!%p187_p2) }
   0xa   : > { %543 = vmatprep.subr.bf16.mxu1 (!%p187_p2), %v583_v3  ;;  %v553_v23 = vpack.c.bf16 (!%p187_p2), %v316_v22, %v315_v21  ;;  %v318_v25 = vld [vmem:[%s709_s3 + $0x58] sm:$0xff] (!%p187_p2)  ;;  %v319_v27 = vld [vmem:[%s709_s3 + $0x60] sm:$0xff] (!%p187_p2)  ;;  %v320_v28 = vld [vmem:[%s709_s3 + $0x68] sm:$0xff] (!%p187_p2) }
   0xb   : > { %v556_v26 = vpack.c.bf16 (!%p187_p2), %v318_v25, %v317_v24  ;;  %v559_v29 = vpack.c.bf16 (!%p187_p2), %v320_v28, %v319_v27  ;;  %v321_v30 = vld [vmem:[%s709_s3 + $0x70] sm:$0xff] (!%p187_p2)  ;;  %v322_v31 = vld [vmem:[%s709_s3 + $0x78] sm:$0xff] (!%p187_p2)  ;;  %v461_v33 = vld [vmem:[%s708_s2] ss:$0 sm:$0xff] (!%p187_p2) }
   0xc   : > { %539 = vmatpush3.bf16.msra.mxu0 (!%p187_p2), %v538_v12  ;;  %v562_v32 = vpack.c.bf16 (!%p187_p2), %v322_v31, %v321_v30  ;;  %v463_v38 = vld [vmem:[%s710_s4] ss:$0 sm:$0xff] (!%p187_p2) }
   0xd   : > { %s713_s19 = smov (!%p212_p3, %s454_s19), 1  ;;  %545 = vmatpush3.bf16.msra.mxu1 %v544_v13 }
   0xe   : > { %s459_s11 = sshll.u32 %s713_s19, 3  ;;  %546 = vmatprep.subr.bf16.mxu1 %v583_v3 }
   0xf   : > { %s215_s20 = scalar_lea.vmem %s706_s0, %s459_s11  ;;  %s219_s25 = scalar_lea.vmem %s711_s5, %s459_s11 }
  0x10   : > { %v220_v16 = vld [vmem:[%s215_s20] sm:$0xff] }
  0x11   : > { %497 = vmatmul.mubr.msk.f32.vlgmr.msra.gmra.mrb[0].mxu0 %vm232_vm1, %v220_v16  ;;  %548 = vmatpush3.bf16.msra.mxu1 %v547_v17 }
  0x12   : > { %549 = vmatprep.subr.bf16.mxu1 %v583_v3 }
  0x15   : > { %551 = vmatpush3.bf16.msra.mxu1 %v550_v20 }
  0x16   : > { %552 = vmatprep.subr.bf16.mxu1 %v583_v3 }
  0x19   : > { %554 = vmatpush3.bf16.msra.mxu1 %v553_v23 }
  0x1a   : > { %555 = vmatprep.subr.bf16.mxu1 %v583_v3 }
  0x1d   : > { %557 = vmatpush3.bf16.msra.mxu1 %v556_v26 }
  0x1e   : > { %558 = vmatprep.subr.bf16.mxu1 %v583_v3 }
  0x21   : > { %560 = vmatpush3.bf16.msra.mxu1 %v559_v29 }
  0x22   : > { %561 = vmatprep.subr.bf16.mxu1 %v583_v3 }
  0x25   : > { %563 = vmatpush3.bf16.msra.mxu1 %v562_v32 }
  0xe4   : > { %v302_v34 = vpop.f32.mrb[0].mxu0 }
  0xe5   : > { %v303_v35 = vadd.f32 %v461_v33, %v302_v34  ;;  %v498_v36 = vpop.f32.mrb[1].mxu0 }
  0xe7   : > { %v306_v37 = vmax.f32 %v303_v35, 0.0 }
  0xe9   : > { %532 = vmatmul.mubr.f32.vlgmr.msra.gmra.mrb[0].mxu1 %v306_v37 }
 0x1bc   : > { %v396_v39 = vpop.f32.mrb[0].mxu1 }
 0x1bd   : > { %v397_v40 = vadd.f32 %v463_v38, %v396_v39  ;;  %v533_v41 = vpop.f32.mrb[1].mxu1 }
 0x1bf   : > { %400 = vst [vmem:[%s219_s25] sm:$0xff] %v397_v40 }
 0x1c0 PF: > { %s15_s18 = sadd.s32 1, %s581_s18  }
 0x1c1   : > { %p12_p4 = scmp.ge.s32.totalorder %s15_s18, 4  }
 0x1c3   :  { %14 = sbr.rel (!%p12_p4) target bundleno = 1 (0x1), region = 70 }

</bundles_post_ra>
